<compile_context>
chip_gen: v5e
topology: v5e:2x2
jax: 0.10.0
libtpu: 0.0.40
codegen_flags: <defaults>
</compile_context>

<pallas_src>
import functools
import math

import jax
import jax.numpy as jnp
from jax import lax
from jax.experimental import pallas as pl
from jax.experimental.pallas import tpu as pltpu


def _round_up(x, m):
    return ((x + m - 1) // m) * m


# ---------------------------------------------------------------------------
# Kernel 1: SnakeBeta + weight-normed ConvTranspose1d (polyphase matmul with
# in-kernel overlap-add + bias).  Output is "packed": row m holds the stride
# consecutive output samples that depend on input rows {m-1, m}.
# ---------------------------------------------------------------------------

def _snake_up_kernel(xl_ref, xm_ref, a_ref, bi_ref, w_ref, b_ref, o_ref,
                     *, s_cout, hb):
    t = pl.program_id(1)
    halo = xl_ref[...]                                  # (hb, Cin) rows [t*TL-hb, t*TL)
    halo = jnp.where(t > 0, halo, jnp.zeros_like(halo))  # conceptual x[-1] = 0
    xin = jnp.concatenate([halo, xm_ref[...]], axis=0)   # (TLi+hb, Cin), aligned M

    xf = xin.astype(jnp.float32)
    sn = jnp.sin(xf * a_ref[...].astype(jnp.float32))
    sx = xf + bi_ref[...].astype(jnp.float32) * sn * sn  # SnakeBeta (hoisted params)

    # Single MXU matmul against the full (Cin, 2*stride*Cout) transpose-conv
    # weight; operands stay in the storage dtype (bf16 path uses bf16 MXU).
    P = jnp.dot(sx.astype(xm_ref.dtype), w_ref[...],
                preferred_element_type=jnp.float32)       # (TLi+hb, 2*s_cout)

    # Polyphase overlap-add: y_packed[m] = P0[m] + P1[m-1].
    y = P[hb:, :s_cout] + P[hb - 1:-1, s_cout:]           # (TLi, s_cout)
    o_ref[...] = (y + b_ref[...].astype(jnp.float32)).astype(o_ref.dtype)


def snake_upsample(x, snake_p, up_p, *, stride, tile_l=1024):
    """SnakeBeta(Cin) then weight-normed ConvTranspose1d(K=2*stride, stride,
    padding=ceil(stride/2)) via an exact polyphase decomposition."""
    B, L, Cin = x.shape
    w_t = up_p["w"]                                       # (Cin, Cout, K) torch layout
    Cout, K = int(w_t.shape[1]), int(w_t.shape[2])
    assert K == 2 * stride
    p_ct = math.ceil(stride / 2)
    Lup = (L - 1) * stride + K - 2 * p_ct

    a_exp = jnp.exp(snake_p["alpha"]).reshape(1, Cin).astype(jnp.float32)
    b_inv = (1.0 / (jnp.exp(snake_p["beta"]) + 1e-9)).reshape(1, Cin).astype(jnp.float32)
    w_mat = jnp.transpose(w_t, (0, 2, 1)).reshape(Cin, K * Cout).astype(x.dtype)
    sc = stride * Cout
    b_rep = jnp.tile(up_p["b"].reshape(1, Cout).astype(jnp.float32), (1, stride))  # (1, sc)

    HB = 8
    TLi = max(HB, min(_round_up(tile_l, HB), _round_up(L + 1, HB)))
    nT = pl.cdiv(L + 1, TLi)              # >= L+1 rows so the tail phase is produced
    Lp = nT * TLi
    xp = jnp.pad(x, ((0, 0), (0, Lp - L), (0, 0)))
    Rh = TLi // HB

    yp = pl.pallas_call(
        functools.partial(_snake_up_kernel, s_cout=sc, hb=HB),
        out_shape=jax.ShapeDtypeStruct((B, Lp, sc), x.dtype),
        grid=(B, nT),
        in_specs=[
            pl.BlockSpec((None, HB, Cin), lambda b, t: (b, jnp.maximum(t * Rh - 1, 0), 0)),
            pl.BlockSpec((None, TLi, Cin), lambda b, t: (b, t, 0)),
            pl.BlockSpec((1, Cin), lambda b, t: (0, 0)),
            pl.BlockSpec((1, Cin), lambda b, t: (0, 0)),
            pl.BlockSpec((Cin, K * Cout), lambda b, t: (0, 0)),
            pl.BlockSpec((1, sc), lambda b, t: (0, 0)),
        ],
        out_specs=pl.BlockSpec((None, TLi, sc), lambda b, t: (b, t, 0)),
        compiler_params=pltpu.CompilerParams(
            dimension_semantics=("parallel", "parallel")),
    )(xp, xp, a_exp, b_inv, w_mat, b_rep)

    # Cheap glue: unpack the packed rows and crop (no overlap-add pass in HBM).
    y_full = yp.reshape(B, Lp * stride, Cout)
    return y_full[:, p_ct:p_ct + Lup, :]


# ---------------------------------------------------------------------------
# Kernel 2: all three ResidualUnits fused.
# Activations live in a "canonical" zero-padded layout of length nLT*TL with
# the real signal at rows [off, off+sig_len); rows outside are kept exactly
# zero (masked after every unit) so the convs' zero padding is implicit.
# ---------------------------------------------------------------------------

def _fused_res_kernel(xl_ref, xm_ref, xr_ref,
                      a1_ref, bi1_ref, w1_ref, b1_ref,
                      a2_ref, bi2_ref, w2_ref, b2_ref,
                      o_ref, *, TL, H, off, sig_end, dils, shrinks):
    t = pl.program_id(1)
    Wn = TL + 2 * H

    # Stitch the (TL + 2H, C) window from HALO-sized neighbour blocks.
    win = jnp.concatenate([xl_ref[...], xm_ref[...], xr_ref[...]], axis=0)

    # One pad-row mask per window, sliced per unit.
    rows = t * TL - H + lax.broadcasted_iota(jnp.int32, (Wn, 1), 0)
    valid = (rows >= off) & (rows < sig_end)

    dot_dt = xm_ref.dtype
    cur = win.astype(jnp.float32)
    start, length = 0, Wn

    for u, d in enumerate(dils):                  # static, unrolled
        S = shrinks[u]                            # halo consumed this unit (>= 3d, mult of 8)
        out_len = length - 2 * S
        base = S - 3 * d

        a1 = a1_ref[u].astype(jnp.float32)
        bi1 = bi1_ref[u].astype(jnp.float32)
        a2 = a2_ref[u].astype(jnp.float32)
        bi2 = bi2_ref[u].astype(jnp.float32)

        # SnakeBeta #1 (f32 math), then cast operand for the MXU.
        s1 = jnp.sin(cur * a1)
        sx = (cur + bi1 * s1 * s1).astype(dot_dt)

        # Dilated 7-tap conv as ONE wide-contraction matmul: (M, 7C) @ (7C, C).
        cols = jnp.concatenate(
            [sx[base + k * d: base + k * d + out_len, :] for k in range(7)], axis=-1)
        h = jnp.dot(cols, w1_ref[u], preferred_element_type=jnp.float32)
        h = h + b1_ref[u].astype(jnp.float32)

        # SnakeBeta #2.
        s2 = jnp.sin(h * a2)
        h = h + bi2 * s2 * s2

        # 1x1 conv + bias + residual (masked previous activation, f32).
        y = jnp.dot(h.astype(dot_dt), w2_ref[u], preferred_element_type=jnp.float32)
        y = y + b2_ref[u].astype(jnp.float32) + cur[S: S + out_len, :]

        # Keep the canonical pad region exactly zero before the next conv.
        start += S
        length = out_len
        y = jnp.where(valid[start: start + length], y, 0.0)
        cur = y

    # sum(shrinks) == H, so cur covers exactly window rows [H, H+TL).
    o_ref[...] = cur.astype(o_ref.dtype)


def fused_residual_units(ypad, res_params, *, off, sig_len, TL, nLT, H,
                         dils, shrinks):
    B, Ltot, C = ypad.shape
    nU = len(res_params)
    f32 = jnp.float32

    a1 = jnp.stack([jnp.exp(rp["snake1"]["alpha"]).reshape(1, C) for rp in res_params]).astype(f32)
    bi1 = jnp.stack([(1.0 / (jnp.exp(rp["snake1"]["beta"]) + 1e-9)).reshape(1, C)
                     for rp in res_params]).astype(f32)
    a2 = jnp.stack([jnp.exp(rp["snake2"]["alpha"]).reshape(1, C) for rp in res_params]).astype(f32)
    bi2 = jnp.stack([(1.0 / (jnp.exp(rp["snake2"]["beta"]) + 1e-9)).reshape(1, C)
                     for rp in res_params]).astype(f32)
    w1 = jnp.stack([rp["conv1"]["w"].reshape(7 * C, C) for rp in res_params]).astype(ypad.dtype)
    b1 = jnp.stack([rp["conv1"]["b"].reshape(1, C) for rp in res_params]).astype(f32)
    w2 = jnp.stack([rp["conv2"]["w"].reshape(C, C) for rp in res_params]).astype(ypad.dtype)
    b2 = jnp.stack([rp["conv2"]["b"].reshape(1, C) for rp in res_params]).astype(f32)

    assert TL % H == 0 and H % 8 == 0 and sum(shrinks) == H
    R = TL // H
    nblocks = nLT * R
    par = lambda b, t: (0, 0, 0)

    kernel = functools.partial(_fused_res_kernel, TL=TL, H=H, off=off,
                               sig_end=off + sig_len, dils=dils, shrinks=shrinks)
    return pl.pallas_call(
        kernel,
        out_shape=jax.ShapeDtypeStruct((B, Ltot, C), ypad.dtype),
        grid=(B, nLT),
        in_specs=[
            pl.BlockSpec((None, H, C), lambda b, t: (b, jnp.maximum(t * R - 1, 0), 0)),
            pl.BlockSpec((None, TL, C), lambda b, t: (b, t, 0)),
            pl.BlockSpec((None, H, C), lambda b, t: (b, jnp.minimum((t + 1) * R, nblocks - 1), 0)),
            pl.BlockSpec((nU, 1, C), par),        # exp(alpha1)
            pl.BlockSpec((nU, 1, C), par),        # 1/(exp(beta1)+eps)
            pl.BlockSpec((nU, 7 * C, C), par),    # conv1 weights (im2col layout)
            pl.BlockSpec((nU, 1, C), par),        # conv1 bias
            pl.BlockSpec((nU, 1, C), par),        # exp(alpha2)
            pl.BlockSpec((nU, 1, C), par),        # 1/(exp(beta2)+eps)
            pl.BlockSpec((nU, C, C), par),        # conv2 (1x1) weights
            pl.BlockSpec((nU, 1, C), par),        # conv2 bias
        ],
        out_specs=pl.BlockSpec((None, TL, C), lambda b, t: (b, t, 0)),
        compiler_params=pltpu.CompilerParams(
            dimension_semantics=("parallel", "parallel")),
    )(ypad, ypad, ypad, a1, bi1, w1, b1, a2, bi2, w2, b2)


# ---------------------------------------------------------------------------
# DecoderBlock forward
# ---------------------------------------------------------------------------

def decoder_block_forward(x, p, *, tile_l=1024):
    """x: (B, L, in_channels) channels-last.  Returns (B, Lout, out_channels)."""
    stride = p["stride"]
    y = snake_upsample(x, p["snake"], p["upsample"], stride=stride, tile_l=tile_l)
    B, Lup, C = y.shape

    dils = tuple(int(rp["dilation"]) for rp in p["res_units"])
    shrinks = tuple(_round_up(3 * d, 8) for d in dils)     # (8, 16, 32) for (1, 3, 9)
    H = sum(shrinks)                                        # 56 >= cumulative receptive field
    off = H
    needed = off + Lup + H
    TL = H * max(1, min(max(tile_l // H, 1), pl.cdiv(needed, H)))
    nLT = pl.cdiv(needed, TL)
    Ltot = nLT * TL

    # One-time pad into the canonical tiled layout (signal at [off, off+Lup)).
    ypad = jnp.pad(y, ((0, 0), (off, Ltot - off - Lup), (0, 0)))
    ypad = fused_residual_units(ypad, p["res_units"], off=off, sig_len=Lup,
                                TL=TL, nLT=nLT, H=H, dils=dils, shrinks=shrinks)
    return ypad[:, off:off + Lup, :]


# ------------------------- parameter construction --------------------------

def _wn_effective_conv1d(key, cin, cout, k, bias=True):
    """weight_norm(Conv1d) effective weight: w = g * v / ||v|| (norm over dims 1,2)."""
    kv, kg, kb = jax.random.split(key, 3)
    scale = 1.0 / math.sqrt(cin * k)
    v = jax.random.normal(kv, (cout, cin, k), jnp.float32) * scale
    norm = jnp.sqrt(jnp.sum(v * v, axis=(1, 2), keepdims=True) + 1e-12)
    g = norm[:, 0, 0] * jax.random.uniform(kg, (cout,), minval=0.5, maxval=1.5)
    w = g[:, None, None] * v / norm                 # (Cout, Cin, K) torch layout
    w = jnp.transpose(w, (2, 1, 0))                 # (K, Cin, Cout) kernel layout
    b = (jax.random.uniform(kb, (cout,), minval=-scale, maxval=scale)
         if bias else None)
    return {"w": w, "b": b}


def _wn_effective_convT1d(key, cin, cout, k):
    """weight_norm(ConvTranspose1d): v shape (Cin, Cout, K), g per input channel."""
    kv, kg, kb = jax.random.split(key, 3)
    scale = 1.0 / math.sqrt(cout * k)
    v = jax.random.normal(kv, (cin, cout, k), jnp.float32) * scale
    norm = jnp.sqrt(jnp.sum(v * v, axis=(1, 2), keepdims=True) + 1e-12)
    g = norm[:, 0, 0] * jax.random.uniform(kg, (cin,), minval=0.5, maxval=1.5)
    w = g[:, None, None] * v / norm                 # (Cin, Cout, K) torch layout
    b = jax.random.uniform(kb, (cout,), minval=-scale, maxval=scale)
    return {"w": w, "b": b}


def _snake_params(key, c):
    # PyTorch init is zeros (log-scale); small random values here so the test
    # exercises the per-channel alpha/beta path non-trivially.
    ka, kb = jax.random.split(key)
    return {"alpha": 0.1 * jax.random.normal(ka, (c,), jnp.float32),
            "beta": 0.1 * jax.random.normal(kb, (c,), jnp.float32)}


def init_residual_unit(key, channels, dilation):
    k1, k2, k3, k4 = jax.random.split(key, 4)
    return {"dilation": dilation,
            "snake1": _snake_params(k3, channels),
            "conv1": _wn_effective_conv1d(k1, channels, channels, 7),
            "snake2": _snake_params(k4, channels),
            "conv2": _wn_effective_conv1d(k2, channels, channels, 1)}


def init_decoder_block(key, cin, cout, stride):
    ks = jax.random.split(key, 5)
    return {"stride": stride,
            "snake": _snake_params(ks[0], cin),
            "upsample": _wn_effective_convT1d(ks[1], cin, cout, 2 * stride),
            "res_units": [init_residual_unit(ks[2 + i], cout, d)
                          for i, d in enumerate((1, 3, 9))]}


# --------------------------- pure-JAX reference -----------------------------

def _ref_snake(x, alpha, beta):
    a = jnp.exp(alpha)[None, None, :]
    b = jnp.exp(beta)[None, None, :]
    s = jnp.sin(x * a)
    return x + (1.0 / (b + 1e-9)) * s * s


def _ref_conv1d(x, w, b, dilation, padding):
    y = lax.conv_general_dilated(
        x, w, window_strides=(1,), padding=[(padding, padding)],
        rhs_dilation=(dilation,), dimension_numbers=("NWC", "WIO", "NWC"),
        precision=lax.Precision.HIGHEST)
    if b is not None:
        y = y + b[None, None, :]
    return y


def _ref_conv_transpose1d(x, w_t, b, stride, padding):
    B, L, Cin = x.shape
    _, Cout, K = w_t.shape
    Lu = (L - 1) * stride + 1
    xu = jnp.zeros((B, Lu, Cin), x.dtype).at[:, ::stride, :].set(x)
    w_conv = jnp.flip(jnp.transpose(w_t, (2, 0, 1)), axis=0)  # (K, Cin, Cout)
    return _ref_conv1d(xu, w_conv, b, 1, K - 1 - padding)


def _ref_residual_unit(x, p):
    d = p["dilation"]
    h = _ref_snake(x, p["snake1"]["alpha"], p["snake1"]["beta"])
    h = _ref_conv1d(h, p["conv1"]["w"], p["conv1"]["b"], d, d * 3)
    h = _ref_snake(h, p["snake2"]["alpha"], p["snake2"]["beta"])
    h = _ref_conv1d(h, p["conv2"]["w"], p["conv2"]["b"], 1, 0)
    return h + x


def _ref_decoder_block(x, p):
    s = p["stride"]
    h = _ref_snake(x, p["snake"]["alpha"], p["snake"]["beta"])
    h = _ref_conv_transpose1d(h, p["upsample"]["w"], p["upsample"]["b"],
                              s, math.ceil(s / 2))
    for rp in p["res_units"]:
        h = _ref_residual_unit(h, rp)
    return h


# ----------------------------------- main -----------------------------------

if __name__ == "__main__":
    key = jax.random.PRNGKey(0)

    # (B, L, in_channels, out_channels, stride) — small shapes, even strides
    # (as used by this audio decoder).
    configs = [
        (2, 16, 32, 16, 4),
        (2, 24, 16, 8, 2),
    ]
    for (B, L, cin, cout, stride) in configs:
        kp, kx, key = jax.random.split(key, 3)
        params = init_decoder_block(kp, cin, cout, stride)
        x = jax.random.normal(kx, (B, L, cin), jnp.float32)

        y = jax.block_until_ready(decoder_block_forward(x, params))
        y_ref = _ref_decoder_block(x, params)

        p_ct = math.ceil(stride / 2)
        exp_len = (L - 1) * stride + 2 * stride - 2 * p_ct
        assert y.shape == (B, exp_len, cout), (y.shape, (B, exp_len, cout))
        assert bool(jnp.all(jnp.isfinite(y)))
        max_err = float(jnp.max(jnp.abs(y - y_ref)))
        assert jnp.allclose(y, y_ref, atol=1e-2, rtol=1e-2), max_err

    # bf16 storage smoke test (halves HBM traffic and uses the bf16 MXU path;
    # accumulation stays f32).
    B, L, cin, cout, stride = configs[0]
    kp, kx = jax.random.split(jax.random.PRNGKey(1))
    params = init_decoder_block(kp, cin, cout, stride)
    params_bf16 = jax.tree_util.tree_map(
        lambda a: a.astype(jnp.bfloat16)
        if isinstance(a, jnp.ndarray) and jnp.issubdtype(a.dtype, jnp.floating)
        else a,
        params)
    xb = jax.random.normal(kx, (B, L, cin), jnp.bfloat16)
    yb = jax.block_until_ready(decoder_block_forward(xb, params_bf16))
    assert bool(jnp.all(jnp.isfinite(yb.astype(jnp.float32))))

    print("KERNEL_OK")
</pallas_src>

<mosaic_0001>
module attributes {stable_mosaic.version = 11 : i64} {
  func.func @_snake_up_kernel(%arg0: i32, %arg1: i32, %arg2: memref<1x8x32xf32, #tpu.memory_space<vmem>>, %arg3: memref<1x24x32xf32, #tpu.memory_space<vmem>>, %arg4: memref<1x32xf32, #tpu.memory_space<vmem>>, %arg5: memref<1x32xf32, #tpu.memory_space<vmem>>, %arg6: memref<32x128xf32, #tpu.memory_space<vmem>>, %arg7: memref<1x64xf32, #tpu.memory_space<vmem>>, %arg8: memref<1x24x64xf32, #tpu.memory_space<vmem>>) attributes {dimension_semantics = [#tpu.dimension_semantics<parallel>, #tpu.dimension_semantics<parallel>], iteration_bounds = array<i64: 2, 1>, scalar_prefetch = 0 : i64, scratch_operands = 0 : i64, tpu.core_type = #tpu.core_type<tc>, window_params = [{transform_indices = @transform_0, window_bounds = array<i64: 1, 8, 32>}, {transform_indices = @transform_1, window_bounds = array<i64: 1, 24, 32>}, {pipeline_mode = #tpu.pipeline_mode<synchronous>, transform_indices = @transform_2, window_bounds = array<i64: 1, 32>}, {pipeline_mode = #tpu.pipeline_mode<synchronous>, transform_indices = @transform_3, window_bounds = array<i64: 1, 32>}, {pipeline_mode = #tpu.pipeline_mode<synchronous>, transform_indices = @transform_4, window_bounds = array<i64: 32, 128>}, {pipeline_mode = #tpu.pipeline_mode<synchronous>, transform_indices = @transform_5, window_bounds = array<i64: 1, 64>}, {transform_indices = @transform_6, window_bounds = array<i64: 1, 24, 64>}]} {
    %c0 = arith.constant 0 : index
    %c0_0 = arith.constant 0 : index
    %c0_1 = arith.constant 0 : index
    %0 = vector.load %arg2[%c0, %c0_0, %c0_1] : memref<1x8x32xf32, #tpu.memory_space<vmem>>, vector<1x8x32xf32>
    %1 = vector.shape_cast %0 : vector<1x8x32xf32> to vector<8x32xf32>
    %c0_i32 = arith.constant 0 : i32
    %2 = arith.cmpi sgt, %arg1, %c0_i32 : i32
    %cst = arith.constant 0.000000e+00 : f32
    %3 = vector.broadcast %cst : f32 to vector<8x32xf32>
    %4 = arith.select %2, %1, %3 : vector<8x32xf32>
    %c0_2 = arith.constant 0 : index
    %c0_3 = arith.constant 0 : index
    %c0_4 = arith.constant 0 : index
    %5 = vector.load %arg3[%c0_2, %c0_3, %c0_4] : memref<1x24x32xf32, #tpu.memory_space<vmem>>, vector<1x24x32xf32>
    %6 = vector.shape_cast %5 : vector<1x24x32xf32> to vector<24x32xf32>
    %7 = tpu.concatenate %4, %6 in 0 : vector<8x32xf32>, vector<24x32xf32> -> vector<32x32xf32>
    %c0_5 = arith.constant 0 : index
    %c0_6 = arith.constant 0 : index
    %8 = vector.load %arg4[%c0_5, %c0_6] : memref<1x32xf32, #tpu.memory_space<vmem>>, vector<1x32xf32>
    %9 = vector.broadcast %8 : vector<1x32xf32> to vector<32x32xf32>
    %10 = arith.mulf %7, %9 : vector<32x32xf32>
    %11 = math.sin %10 : vector<32x32xf32>
    %c0_7 = arith.constant 0 : index
    %c0_8 = arith.constant 0 : index
    %12 = vector.load %arg5[%c0_7, %c0_8] : memref<1x32xf32, #tpu.memory_space<vmem>>, vector<1x32xf32>
    %13 = vector.broadcast %12 : vector<1x32xf32> to vector<32x32xf32>
    %14 = arith.mulf %13, %11 : vector<32x32xf32>
    %15 = arith.mulf %14, %11 : vector<32x32xf32>
    %16 = arith.addf %7, %15 : vector<32x32xf32>
    %c0_9 = arith.constant 0 : index
    %c0_10 = arith.constant 0 : index
    %17 = vector.load %arg6[%c0_9, %c0_10] : memref<32x128xf32, #tpu.memory_space<vmem>>, vector<32x128xf32>
    %cst_11 = arith.constant dense<0.000000e+00> : vector<32x128xf32>
    %18 = tpu.matmul %16, %17, %cst_11 {dimension_numbers = #tpu.dot_dimension_numbers<[1], [0], [0], [1], [0, 0, 1, 1], [], []>} : vector<32x32xf32>, vector<32x128xf32>, vector<32x128xf32> -> vector<32x128xf32>
    %19 = vector.extract_strided_slice %18 {offsets = [8, 0], sizes = [24, 64], strides = [1, 1]} : vector<32x128xf32> to vector<24x64xf32>
    %20 = vector.extract_strided_slice %18 {offsets = [7, 64], sizes = [24, 64], strides = [1, 1]} : vector<32x128xf32> to vector<24x64xf32>
    %21 = arith.addf %19, %20 : vector<24x64xf32>
    %c0_12 = arith.constant 0 : index
    %c0_13 = arith.constant 0 : index
    %22 = vector.load %arg7[%c0_12, %c0_13] : memref<1x64xf32, #tpu.memory_space<vmem>>, vector<1x64xf32>
    %23 = vector.broadcast %22 : vector<1x64xf32> to vector<24x64xf32>
    %24 = arith.addf %21, %23 : vector<24x64xf32>
    %c0_14 = arith.constant 0 : index
    %c0_15 = arith.constant 0 : index
    %c0_16 = arith.constant 0 : index
    %25 = vector.load %arg8[%c0_14, %c0_15, %c0_16] : memref<1x24x64xf32, #tpu.memory_space<vmem>>, vector<1x24x64xf32>
    %26 = vector.shape_cast %25 : vector<1x24x64xf32> to vector<24x64xf32>
    %27 = vector.shape_cast %24 : vector<24x64xf32> to vector<1x24x64xf32>
    tpu.vector_store %arg8[%c0_14, %c0_15, %c0_16], %27 {strides = array<i32>} : memref<1x24x64xf32, #tpu.memory_space<vmem>>, vector<1x24x64xf32>,
    return
  }
  func.func @transform_0(%arg0: i32, %arg1: i32) -> (i32, i32, i32) {
    %c3_i32 = arith.constant 3 : i32
    %0 = arith.muli %arg1, %c3_i32 : i32
    %c1_i32 = arith.constant 1 : i32
    %1 = arith.subi %0, %c1_i32 : i32
    %c0_i32 = arith.constant 0 : i32
    %2 = arith.maxsi %1, %c0_i32 : i32
    %c0_i32_0 = arith.constant 0 : i32
    %c0_i32_1 = arith.constant 0 : i32
    return %arg0, %2, %c0_i32_0 : i32, i32, i32
  }
  func.func @transform_1(%arg0: i32, %arg1: i32) -> (i32, i32, i32) {
    %c0_i32 = arith.constant 0 : i32
    %c0_i32_0 = arith.constant 0 : i32
    return %arg0, %arg1, %c0_i32 : i32, i32, i32
  }
  func.func @transform_2(%arg0: i32, %arg1: i32) -> (i32, i32) {
    %c0_i32 = arith.constant 0 : i32
    %c0_i32_0 = arith.constant 0 : i32
    %c0_i32_1 = arith.constant 0 : i32
    return %c0_i32, %c0_i32_0 : i32, i32
  }
  func.func @transform_3(%arg0: i32, %arg1: i32) -> (i32, i32) {
    %c0_i32 = arith.constant 0 : i32
    %c0_i32_0 = arith.constant 0 : i32
    %c0_i32_1 = arith.constant 0 : i32
    return %c0_i32, %c0_i32_0 : i32, i32
  }
  func.func @transform_4(%arg0: i32, %arg1: i32) -> (i32, i32) {
    %c0_i32 = arith.constant 0 : i32
    %c0_i32_0 = arith.constant 0 : i32
    %c0_i32_1 = arith.constant 0 : i32
    return %c0_i32, %c0_i32_0 : i32, i32
  }
  func.func @transform_5(%arg0: i32, %arg1: i32) -> (i32, i32) {
    %c0_i32 = arith.constant 0 : i32
    %c0_i32_0 = arith.constant 0 : i32
    %c0_i32_1 = arith.constant 0 : i32
    return %c0_i32, %c0_i32_0 : i32, i32
  }
  func.func @transform_6(%arg0: i32, %arg1: i32) -> (i32, i32, i32) {
    %c0_i32 = arith.constant 0 : i32
    %c0_i32_0 = arith.constant 0 : i32
    return %arg0, %arg1, %c0_i32 : i32, i32, i32
  }
}

</mosaic_0001>

<bundles_post_ra>
// kernel: tpu_custom_call.1
= control target key start
LH: loop header
LB: loop body
LE: loop exit
PB: predicated region body
PF: predicated region fallthrough
CT: control target
= control target key end

     0   :  { %s2224_s0 = inlined_call_operand.hbm [shape: f32[2,24,32], index: 0, kind: input, shape index: {}]   ;;  %s2225_s1 = inlined_call_operand.hbm [shape: f32[2,24,32], index: 1, kind: input, shape index: {}]   ;;  %s2226_s2 = inlined_call_operand.vmem [shape: f32[1,32], index: 2, kind: input, shape index: {}]   ;;  %s2227_s3 = inlined_call_operand.vmem [shape: f32[1,32], index: 3, kind: input, shape index: {}]   ;;  %s2228_s4 = inlined_call_operand.hbm [shape: f32[32,128], index: 4, kind: input, shape index: {}]   ;;  %s2229_s5 = inlined_call_operand.vmem [shape: f32[1,64], index: 5, kind: input, shape index: {}]   ;;  %s2230_s6 = inlined_call_operand.hbm [shape: f32[2,24,64], index: 6, kind: output, shape index: {}]  }
   0x1   :  { %2237 = sst [smem:[#allocation18_spill]] %s2224_s0 }
   0x2   :  { %2238 = sst [smem:[#allocation19_spill]] %s2228_s4 }
   0x3   :  { %11 = vsyncpa [#allocation3], 0 }
   0x4   :  { %13 = vsyncpa [#allocation3 + $0x1], 0 }
   0x5   :  { %14 = vsyncpa [#allocation6], 0 }
   0x6   :  { %16 = vsyncpa [#allocation6 + $0x1], 0 }
   0x7   :  { %17 = vsyncpa [#allocation4], 0 }
   0x8   :  { %19 = vsyncpa [#allocation4 + $0x1], 0  ;;  %s1611_s21 = smov 0   ;;  %s1613_s22 = smov 0  }
   0x9   :  { %s1615_s23 = smov 0   ;;  %s1617_s24 = smov 0  }
   0xa   :  { %s1619_s25 = smov 0   ;;  %s1621_s26 = smov 0  }
   0xb LB: > { %2239 = sst [smem:[#allocation13_spill]] %s1549_s23  ;;  %s1642_s27 = sadd.s32 4294967295, %s1561_s26   ;;  %s1561_s26 = sphi %s1621_s26, %s25_s26   ;;  %s1557_s25 = sphi %s1619_s25, %s2264_s25   ;;  %s1553_s24 = sphi %s1617_s24, %s2263_s24   ;;  %s1549_s23 = sphi %s1615_s23, %s2262_s23   ;;  %s1545_s22 = sphi %s1613_s22, %s2266_s22   ;;  %s1541_s21 = sphi %s1611_s21, %s2265_s21  }
   0xc   : > { %2240 = sst [smem:[#allocation14_spill]] %s1557_s25  ;;  %p1242_p0 = scmp.ge.s32.totalorder %s1561_s26, 1 }
   0xd   : > { %p68_p1 = scmp.eq.s32.totalorder %s1642_s27, 0  ;;  %p218_p2 = scmp.lt.s32.totalorder %s1561_s26, 3 }
   0xe   : > { %s2241_s4 = sld [smem:[#allocation19_spill]]  ;;  %s1563_s8 = smov [#allocation7]  }
   0xf   : > { %p1650_p3 = pnand %p1242_p0, %p218_p2  ;;  %s237_s9 = sshll.u32 %s1563_s8, 4  ;;  %s238_s9 = int_to_ptr.vmem [resolvable:$true] %s237_s9 }
  0x10   : > { %p1244_p6 = scmp.ge.s32.totalorder %s1561_s26, 2  ;;  %s2231_s10 = smov 128  }
  0x11   : > { %p1297_p4 = pneg %p1650_p3  ;;  %s2232_s11 = smov 8  }
  0x12   : > { %s1241_s12 = sadd.s32 4294967294, %s1561_s26   ;;  %s37_s13 = sadd.s32 1, %s1557_s25 }
  0x13   : > { %p1298_p5 = pnand %p1297_p4, %p68_p1  ;;  %s54_s14 = sadd.s32 1, %s1549_s23 }
  0x14   : > { %s235_s30 = sshll.u32 %s2241_s4, 4  ;;  %p39_p7 = scmp.ge.s32.totalorder %s37_s13, 2  ;;  %s236_s30 = int_to_ptr.hbm [resolvable:$true] %s235_s30 }
  0x15   : > { %1300 = dma.hbm_to_vmem [thread:$0]  (!%p1298_p5), %s236_s30, 512, %s238_s9, [#allocation6], %s2231_s10, %s2231_s10, %s2232_s11  }
  0x16   : > { %p61_p8 = scmp.ne.s32.totalorder %s1549_s23, %s1545_s22  ;;  %p62_p9 = scmp.eq.s32.totalorder %s1561_s26, 0 }
  0x17   : > { %p67_p10 = scmp.ne.s32.totalorder %s1545_s22, %s1541_s21  ;;  %s2268_s13 = smov (%p39_p7, %s37_s13), 0 }
  0x18   : > { %2243 = sst [smem:[#allocation15_spill]] %s2268_s13  ;;  %p1672_p11 = por %p62_p9, %p61_p8 }
  0x19   : > { %p1678_p12 = por %p68_p1, %p67_p10  ;;  %s49_s17 = ssub.s32 %s1557_s25, %s2268_s13 }
  0x1a   : > { %p205_p13 = scmp.eq.s32.totalorder %s1642_s27, 1  ;;  %p52_p0 = scmp.eq.s32.totalorder %s49_s17, 0 }
  0x1b   : > { %p211_p2 = scmp.eq.s32.totalorder %s1241_s12, 1  ;;  %p1313_p5 = scmp.lt.s32.totalorder %s1561_s26, 2 }
  0x1c   : > { %p1685_p4 = por %p205_p13, %p61_p8  ;;  %s254_s28 = sand.u32 1, %s1549_s23  }
  0x1d   : > { %s1691_s19 = scalar_select %p52_p0, %s1549_s23, %s54_s14  }
  0x1e   : > { %p1693_p7 = por %p211_p2, %p67_p10  ;;  %s1245_s29 = sshll.u32 %s254_s28, 3 }
  0x1f   : > { %2247 = sst [smem:[#allocation16_spill]] %s1691_s19  ;;  %s1282_s30 = smul.u32 24, %s1557_s25 }
  0x20   : > { %s2248_s20 = scalar_select %p1693_p7, 1, 0 }
  0x21   : > { %s258_s8 = scalar_lea.vmem [#allocation2], %s1245_s29  ;;  %p1701_p9 = pnand %p1313_p5, %p1672_p11 }
  0x22   : > { %2249 = sst [smem:[#allocation17_spill]] %s2248_s20  ;;  %s272_s9 = sshll.u32 %s258_s8, 4  ;;  %s273_s9 = int_to_ptr.vmem [resolvable:$true] %s272_s9 }
  0x23   : > { %s2251_s0 = sld [smem:[#allocation18_spill]]  ;;  %s1283_s4 = smul.u32 24, %s254_s28 }
  0x24   : > { %s255_s13 = scalar_lea.sflag [#allocation3], %s254_s28  ;;  %s290_s15 = scalar_lea.hbm %s2225_s1, %s1282_s30 }
  0x25   : > { %s291_s25 = sshll.u32 %s290_s15, 4  ;;  %s283_s19 = scalar_lea.vmem [#allocation5], %s1283_s4  ;;  %s292_s25 = int_to_ptr.hbm [resolvable:$true] %s291_s25 }
  0x26   : > { %s293_s23 = sshll.u32 %s283_s19, 4  ;;  %s279_s10 = sand.u32 1, %s1561_s26   ;;  %s294_s23 = int_to_ptr.vmem [resolvable:$true] %s293_s23 }
  0x27   : > { %s280_s17 = scalar_lea.sflag [#allocation6], %s279_s10  ;;  %s2253_s20 = smov 128  }
  0x28   : > { %305 = sbr.rel (%p1650_p3) target bundleno = 516 (0x204), region = 44 }
  0x29   : > { %s268_s14 = scalar_lea.hbm %s2251_s0, %s1282_s30  ;;  %s2252_s0 = smov 8  }
  0x2a   : > { %s270_s11 = sshll.u32 %s268_s14, 4  ;;  %s271_s11 = int_to_ptr.hbm [resolvable:$true] %s270_s11 }
  0x2b   : > { %1304 = dma.hbm_to_vmem [thread:$0]  (!%p1701_p9), %s271_s11, 128, %s273_s9, %s255_s13  }
  0x2c   : > { %1307 = dma.hbm_to_vmem [thread:$0]  (!%p1701_p9), %s292_s25, 384, %s294_s23, %s280_s17, %s2253_s20, %s2253_s20, %s2252_s0  }
  0x2d   : > { %s1722_s11 = sand.u32 1, %s1545_s22  }
  0x2e   : > { %s308_s13 = scalar_lea.sflag [#allocation3], %s1722_s11 }
  0x2f   : > { %1524 = dma.done.wait (%p1678_p12), %s308_s13, 128  }
  0x30   : > { %1526 = vsyncadd (%p1678_p12), %s308_s13, 4294967168  ;;  %s317_s4 = sand.u32 1, %s1642_s27   ;;  %s1285_s0 = smul.u32 24, %s1722_s11 }
  0x31   : > { %s318_s23 = scalar_lea.sflag [#allocation6], %s317_s4 }
  0x32   : > { %s1733_s25 = scalar_lea.vmem [#allocation5], %s1285_s0 }
  0x33   : > { %1528 = dma.done.wait (%p1678_p12), %s318_s23, 384  }
  0x34   : > { %1530 = vsyncadd (%p1678_p12), %s318_s23, 4294966912 }
  0x35   : > { %1532 = dma.done.wait (%p68_p1), [#allocation6], 512  }
  0x36   : > { %1534 = vsyncadd (%p68_p1), [#allocation6], 4294966784  ;;  %v1023_v0 = vld [vmem:[#allocation7 + $0x18] sm:$0xff]  ;;  %v1022_v1 = vld [vmem:[#allocation7 + $0x10] sm:$0xff]  ;;  %v1566_v35 = vmov 683565275  }
  0x37   : > { %1049 = vmatpush.msra.mxu0 %v1023_v0  ;;  %1270 = vmatpush.msra.mxu1 %v1023_v0  ;;  %v1021_v2 = vld [vmem:[#allocation7 + $0x8] sm:$0xff]  ;;  %v1746_v3 = vld [vmem:[%s2226_s2] ss:$0 sm:$0xff]  ;;  %v374_v5 = vld [vmem:[%s1733_s25 + $0x8] sm:$0xff]  ;;  %v1567_v37 = vmov 2475754826  }
  0x38   : > { %1271 = vmatpush.msra.mxu2 %v1023_v0  ;;  %1272 = vmatpush.msra.mxu3 %v1023_v0  ;;  %v1749_v4 = vld [vmem:[%s1733_s25] sm:$0xff]  ;;  %v1753_v6 = vmul.f32 0.0, %v1746_v3  ;;  %v1760_v8 = vmul.f32 %v1746_v3, %v374_v5  ;;  %v1020_v9 = vld [vmem:[#allocation7] sm:$0xff]  ;;  %v1568_v39 = vmov 2131351028   ;;  %s1573_s20 = smov 64  }
  0x39   : > { %1050 = vmatpush.msra.mxu0 %v1022_v1  ;;  %1273 = vmatpush.msra.mxu1 %v1022_v1  ;;  %v1757_v7 = vmul.f32 %v1746_v3, %v1749_v4  ;;  %v1569_v41 = vmov 2102212464   ;;  %v1570_v43 = vmov 920167782   ;;  %v1571_v52 = vmov 1326507024  }
  0x3a   : > { %1274 = vmatpush.msra.mxu2 %v1022_v1  ;;  %1275 = vmatpush.msra.mxu3 %v1022_v1  ;;  %v384_v10 = vand.u32 2147483647, %v1753_v6  ;;  %v387_v11 = vand.u32 2139095040, %v1753_v6  ;;  %v697_v14 = vand.u32 2139095040, %v1760_v8  ;;  %s360_s9 = scalar_lea.vmem [#allocation8], %s1285_s0  ;;  %s1286_s12 = smul.u32 24, %s1553_s24 }
  0x3b   : > { %1051 = vmatpush.msra.mxu0 %v1021_v2  ;;  %1276 = vmatpush.msra.mxu1 %v1021_v2  ;;  %v539_v12 = vand.u32 2147483647, %v1757_v7  ;;  %v542_v13 = vand.u32 2139095040, %v1757_v7  ;;  %s1116_s15 = sshll.u32 %s360_s9, 4  ;;  %s1102_s17 = scalar_lea.sflag [#allocation4], %s1722_s11  ;;  %s1117_s15 = int_to_ptr.vmem [resolvable:$true] %s1116_s15 }
  0x3c   : > { %1277 = vmatpush.msra.mxu2 %v1021_v2  ;;  %1278 = vmatpush.msra.mxu3 %v1021_v2  ;;  %v388_v15 = vshrl.u32 %v387_v11, 23  ;;  %v391_v16 = vand.u32 8388607, %v384_v10  ;;  %v698_v22 = vshrl.u32 %v697_v14, 23  ;;  %s1115_s8 = scalar_lea.hbm %s2230_s6, %s1286_s12  ;;  %s1491_s23 = scalar_lea.hbm %s2230_s6, 48 }
  0x3d   : > { %1052 = vmatpush.msra.mxu0 %v1020_v9  ;;  %1279 = vmatpush.msra.mxu1 %v1020_v9  ;;  %v543_v17 = vshrl.u32 %v542_v13, 23  ;;  %v546_v18 = vand.u32 8388607, %v539_v12  ;;  %s1118_s10 = sshll.u32 %s1115_s8, 4  ;;  %s1119_s10 = int_to_ptr.hbm [resolvable:$true] %s1118_s10 }
  0x3e   : > { %1280 = vmatpush.msra.mxu2 %v1020_v9  ;;  %1281 = vmatpush.msra.mxu3 %v1020_v9  ;;  %v1251_v19 = vadd.s32 4294967169, %v388_v15  ;;  %v392_v20 = vor.u32 8388608, %v391_v16  ;;  %v1257_v28 = vadd.s32 4294967169, %v698_v22  ;;  %s1485_s13 = sshra.s32 %s1119_s10, 4  ;;  %s1486_s13 = int_to_ptr.hbm [resolvable:$true] %s1485_s13 }
  0x3f   : > { %v1254_v21 = vadd.s32 4294967169, %v543_v17  ;;  %v547_v24 = vor.u32 8388608, %v546_v18  ;;  %s1487_s4 = scalar_lea.hbm %s1486_s13, 24  ;;  %p1492_p10 = scmp.lt.s32.totalorder %s1486_s13, %s2230_s6 }
  0x40   : > { %v394_v23 = vadd.s32 1, %v1251_v19  ;;  %v1771_v27 = vshll.u32 %v392_v20, 8  ;;  %v1785_v46 = vadd.s32 1, %v1257_v28  ;;  %p1488_p1 = scmp.ne.s32.totalorder %s1486_s13, %s1487_s4  ;;  %p1493_p11 = scmp.lt.s32.totalorder %s1491_s23, %s1487_s4 }
  0x41   : > { %v549_v25 = vadd.s32 1, %v1254_v21  ;;  %v1777_v33 = vshll.u32 %v547_v24, 8 }
  0x42   : > { %vm395_vm0 = vcmp.gt.s32.totalorder %v394_v23, 0  ;;  %v433_v45 = vand.u32 65535, %v1771_v27  ;;  %v434_v50 = vshrl.u32 %v1771_v27, 16  ;;  %vm705_vm15 = vcmp.gt.s32.totalorder %v1785_v46, 0  ;;  %p1489_p3 = pnand %p1488_p1, %p1685_p4  ;;  %p1494_p12 = por %p1493_p11, %p1492_p10 }
  0x43   : > { %v396_v26 = vsel %vm395_vm0, %v394_v23, 0  ;;  %vm550_vm1 = vcmp.gt.s32.totalorder %v549_v25, 0 }
  0x44   : > { %v398_v29 = vand.u32 31, %v396_v26  ;;  %v551_v30 = vsel %vm550_vm1, %v549_v25, 0  ;;  %v1773_v31 = vshrl.u32 %v396_v26, 5  ;;  %p1490_p8 = pneg %p1489_p3 }
  0x45   : > { %v1775_v32 = vand.u32 31, %v551_v30  ;;  %v1805_v63 = vshrl.u32 %v551_v30, 5 }
  0x46   : > { %v399_v34 = vsub.s32 32, %v398_v29  ;;  %v401_v36 = vshll.u32 %v1566_v35, %v398_v29  ;;  %v404_v38 = vshll.u32 %v1567_v37, %v398_v29  ;;  %v407_v40 = vshll.u32 %v1568_v39, %v398_v29  ;;  %p1495_p13 = pnand %p1494_p12, %p1490_p8 }
  0x47   : > { %v410_v42 = vshll.u32 %v1569_v41, %v398_v29  ;;  %v413_v44 = vshll.u32 %v1570_v43, %v398_v29  ;;  %vm416_vm2 = vcmp.lt.s32.totalorder %v1773_v31, 1  ;;  %vm419_vm3 = vcmp.lt.s32.totalorder %v1773_v31, 4 }
  0x48   : > { %v402_v47 = vshrl.u32 %v1567_v37, %v399_v34  ;;  %v405_v48 = vshrl.u32 %v1568_v39, %v399_v34  ;;  %v408_v49 = vshrl.u32 %v1569_v41, %v399_v34  ;;  %v411_v51 = vshrl.u32 %v1570_v43, %v399_v34 }
  0x49   : > { %v414_v53 = vshrl.u32 %v1571_v52, %v399_v34  ;;  %v1796_v57 = vsub.s32 32, %v1775_v32  ;;  %v400_v58 = vshrl.u32 %v1566_v35, %v399_v34  ;;  %vm418_vm4 = vcmp.lt.s32.totalorder %v1773_v31, 3 }
  0x4a   : > { %v403_v54 = vor.u32 %v402_v47, %v401_v36  ;;  %v406_v55 = vor.u32 %v405_v48, %v404_v38  ;;  %v409_v56 = vor.u32 %v408_v49, %v407_v40  ;;  %v412_v59 = vor.u32 %v411_v51, %v410_v42 }
  0x4b   : > { %v415_v60 = vor.u32 %v414_v53, %v413_v44  ;;  %vm417_vm5 = vcmp.lt.s32.totalorder %v1773_v31, 2  ;;  %v556_v2 = vshll.u32 %v1566_v35, %v1775_v32  ;;  %v559_v5 = vshll.u32 %v1567_v37, %v1775_v32 }
  0x4c   : > { %v424_v61 = vsel %vm416_vm2, %v403_v54, %v406_v55  ;;  %v428_v62 = vsel %vm416_vm2, %v406_v55, %v409_v56  ;;  %v425_v0 = vsel %vm419_vm3, %v412_v59, 920167782  ;;  %v421_v9 = vsel %vm419_vm3, %v409_v56, 2102212464 }
  0x4d   : > { %v429_v1 = vsel %vm419_vm3, %v415_v60, 1326507024  ;;  %v426_v11 = vsel %vm418_vm4, %v409_v56, %v425_v0  ;;  %v557_v14 = vshrl.u32 %v1567_v37, %v1796_v57  ;;  %v420_v15 = vsel %vm416_vm2, %v400_v58, %v403_v54 }
  0x4e   : > { %v430_v13 = vsel %vm418_vm4, %v412_v59, %v429_v1  ;;  %v427_v16 = vsel %vm417_vm5, %v424_v61, %v426_v11  ;;  %v560_v18 = vshrl.u32 %v1568_v39, %v1796_v57  ;;  %v422_v23 = vsel %vm418_vm4, %v406_v55, %v421_v9 }
  0x4f   : > { %v431_v17 = vsel %vm417_vm5, %v428_v62, %v430_v13  ;;  %v457_v21 = vand.u32 65535, %v427_v16  ;;  %v458_v22 = vshrl.u32 %v427_v16, 16  ;;  %v1833_v24 = vor.u32 %v557_v14, %v556_v2 }
  0x50   : > { %v435_v19 = vand.u32 65535, %v431_v17  ;;  %v436_v20 = vshrl.u32 %v431_v17, 16  ;;  %v1835_v25 = vor.u32 %v560_v18, %v559_v5  ;;  %v562_v26 = vshll.u32 %v1568_v39, %v1775_v32 }
  0x51   : > { %v563_v34 = vshrl.u32 %v1569_v41, %v1796_v57  ;;  %v459_v38 = vmul.u32 %v457_v21, %v433_v45  ;;  %v460_v40 = vmul.u32 %v458_v22, %v433_v45  ;;  %v461_v42 = vmul.u32 %v457_v21, %v434_v50 }
  0x52   : > { %v437_v28 = vmul.u32 %v435_v19, %v433_v45  ;;  %v438_v29 = vmul.u32 %v436_v20, %v433_v45  ;;  %v439_v30 = vmul.u32 %v435_v19, %v434_v50  ;;  %v440_v36 = vmul.u32 %v436_v20, %v434_v50 }
  0x53   : > { %v462_v49 = vmul.u32 %v458_v22, %v434_v50  ;;  %v463_v53 = vshll.u32 %v460_v40, 16  ;;  %v464_v54 = vshrl.u32 %v460_v40, 16  ;;  %v465_v55 = vshll.u32 %v461_v42, 16 }
  0x54   : > { %v441_v44 = vshll.u32 %v438_v29, 16  ;;  %v442_v47 = vshrl.u32 %v438_v29, 16  ;;  %v443_v48 = vshll.u32 %v439_v30, 16  ;;  %v444_v51 = vshrl.u32 %v439_v30, 16 }
  0x55   : > { %v466_v58 = vshrl.u32 %v461_v42, 16  ;;  %v565_v59 = vshll.u32 %v1569_v41, %v1775_v32  ;;  %v1572_v60 = vmov 0   ;;  %vm467_vm7 = vc.u32 %v459_v38, %v463_v53 }
  0x56   : > { %vm445_vm6 = vc.u32 %v437_v28, %v441_v44  ;;  %v447_v56 = vadd.s32 %v441_v44, %v437_v28  ;;  %v469_v45 = vadd.s32 %v463_v53, %v459_v38  ;;  %v566_v62 = vshrl.u32 %v1570_v43, %v1796_v57 }
  0x57   : > { %v446_v61 = vsel %vm445_vm6, 1, %v1572_v60  ;;  %v468_v50 = vsel %vm467_vm7, 1, %v1572_v60  ;;  %v568_v1 = vshll.u32 %v1570_v43, %v1775_v32  ;;  %v564_v9 = vor.u32 %v563_v34, %v562_v26 }
  0x58   : > { %v448_v0 = vadd.s32 %v446_v61, %v440_v36  ;;  %vm449_vm8 = vc.u32 %v447_v56, %v443_v48  ;;  %v470_v5 = vadd.s32 %v468_v50, %v462_v49  ;;  %vm471_vm9 = vc.u32 %v469_v45, %v465_v55 }
  0x59   : > { %v450_v2 = vsel %vm449_vm8, 1, %v1572_v60  ;;  %v472_v13 = vsel %vm471_vm9, 1, %v1572_v60  ;;  %v567_v14 = vor.u32 %v566_v62, %v565_v59  ;;  %v569_v16 = vshrl.u32 %v1571_v52, %v1796_v57 }
  0x5a   : > { %v452_v11 = vadd.s32 %v450_v2, %v448_v0  ;;  %v1853_v17 = vadd.s32 %v469_v45, %v465_v55  ;;  %v474_v18 = vadd.s32 %v472_v13, %v470_v5  ;;  %vm571_vm10 = vcmp.lt.s32.totalorder %v1805_v63, 1 }
  0x5b   : > { %vm573_vm11 = vcmp.lt.s32.totalorder %v1805_v63, 3  ;;  %v570_v19 = vor.u32 %v569_v16, %v568_v1  ;;  %vm572_vm12 = vcmp.lt.s32.totalorder %v1805_v63, 2  ;;  %vm574_vm13 = vcmp.lt.s32.totalorder %v1805_v63, 4 }
  0x5c   : > { %v453_v32 = vadd.s32 %v452_v11, %v442_v47  ;;  %v423_v20 = vsel %vm417_vm5, %v420_v15, %v422_v23  ;;  %v475_v21 = vadd.s32 %v474_v18, %v464_v54  ;;  %v579_v22 = vsel %vm571_vm10, %v1833_v24, %v1835_v25 }
  0x5d   : > { %v580_v26 = vsel %vm574_vm13, %v567_v14, 920167782  ;;  %v583_v30 = vsel %vm571_vm10, %v1835_v25, %v564_v9  ;;  %v588_v31 = vand.u32 65535, %v1777_v33  ;;  %v584_v34 = vsel %vm574_vm13, %v570_v19, 1326507024 }
  0x5e   : > { %v1867_v28 = vadd.s32 %v453_v32, %v444_v51  ;;  %v581_v29 = vsel %vm573_vm11, %v564_v9, %v580_v26  ;;  %v476_v15 = vadd.s32 %v475_v21, %v466_v58  ;;  %v589_v36 = vshrl.u32 %v1777_v33, 16 }
  0x5f   : > { %v582_v23 = vsel %vm572_vm12, %v579_v22, %v581_v29  ;;  %v477_v38 = vmul.u32 %v1771_v27, %v423_v20  ;;  %v585_v40 = vsel %vm573_vm11, %v567_v14, %v584_v34  ;;  %v555_v49 = vshrl.u32 %v1566_v35, %v1796_v57 }
  0x60   : > { %vm479_vm14 = vc.u32 %v1867_v28, %v1853_v17  ;;  %v612_v42 = vand.u32 65535, %v582_v23  ;;  %v480_v44 = vadd.s32 1, %v476_v15  ;;  %v586_v47 = vsel %vm572_vm12, %v583_v30, %v585_v40 }
  0x61   : > { %v613_v48 = vshrl.u32 %v582_v23, 16  ;;  %v590_v51 = vand.u32 65535, %v586_v47  ;;  %v591_v53 = vshrl.u32 %v586_v47, 16  ;;  %v576_v62 = vsel %vm574_vm13, %v564_v9, 2102212464 }
  0x62   : > { %v481_v27 = vsel %vm479_vm14, %v480_v44, %v476_v15  ;;  %v614_v54 = vmul.u32 %v612_v42, %v588_v31  ;;  %v616_v56 = vmul.u32 %v612_v42, %v589_v36  ;;  %v575_v11 = vsel %vm571_vm10, %v555_v49, %v1833_v24 }
  0x63   : > { %v615_v55 = vmul.u32 %v613_v48, %v588_v31  ;;  %v482_v58 = vadd.s32 %v481_v27, %v477_v38  ;;  %v592_v59 = vmul.u32 %v590_v51, %v588_v31  ;;  %v593_v61 = vmul.u32 %v591_v53, %v588_v31 }
  0x64   : > { %v594_v45 = vmul.u32 %v590_v51, %v589_v36  ;;  %v617_v0 = vmul.u32 %v613_v48, %v589_v36  ;;  %v595_v2 = vmul.u32 %v591_v53, %v589_v36  ;;  %v620_v13 = vshll.u32 %v616_v56, 16 }
  0x65   : > { %v618_v50 = vshll.u32 %v615_v55, 16  ;;  %v483_v1 = vadd.s32 536870912, %v482_v58  ;;  %v596_v57 = vshll.u32 %v593_v61, 16  ;;  %v706_v14 = vsel %vm705_vm15, %v1785_v46, 0 }
  0x66   : > { %v598_v5 = vshll.u32 %v594_v45, 16  ;;  %v577_v32 = vsel %vm573_vm11, %v1835_v25, %v576_v62  ;;  %v597_v22 = vshrl.u32 %v593_v61, 16  ;;  %v599_v29 = vshrl.u32 %v594_v45, 16 }
  0x67   : > { %vm622_vm0 = vc.u32 %v614_v54, %v618_v50  ;;  %v484_v16 = vshrl.u32 %v483_v1, 30  ;;  %vm600_vm1 = vc.u32 %v592_v59, %v596_v57  ;;  %v602_v18 = vadd.s32 %v596_v57, %v592_v59 }
  0x68   : > { %v623_v9 = vsel %vm622_vm0, 1, %v1572_v60  ;;  %v601_v19 = vsel %vm600_vm1, 1, %v1572_v60  ;;  %v624_v20 = vadd.s32 %v618_v50, %v614_v54  ;;  %v619_v30 = vshrl.u32 %v615_v55, 16 }
  0x69   : > { %v625_v21 = vadd.s32 %v623_v9, %v617_v0  ;;  %v485_v24 = vshll.u32 %v484_v16, 30  ;;  %v603_v26 = vadd.s32 %v601_v19, %v595_v2  ;;  %vm604_vm2 = vc.u32 %v602_v18, %v598_v5 }
  0x6a   : > { %v605_v46 = vsel %vm604_vm2, 1, %v1572_v60  ;;  %vm626_vm3 = vc.u32 %v624_v20, %v620_v13  ;;  %v708_v34 = vand.u32 31, %v706_v14  ;;  %v621_v36 = vshrl.u32 %v616_v56, 16 }
  0x6b   : > { %v486_v31 = vsub.s32 %v482_v58, %v485_v24  ;;  %v607_v15 = vadd.s32 %v605_v46, %v603_v26  ;;  %v627_v23 = vsel %vm626_vm3, 1, %v1572_v60  ;;  %v694_v38 = vand.u32 2147483647, %v1760_v8 }
  0x6c   : > { %v629_v25 = vadd.s32 %v627_v23, %v625_v21  ;;  %v1906_v44 = vadd.s32 %v624_v20, %v620_v13  ;;  %v578_v47 = vsel %vm572_vm12, %v575_v11, %v577_v32  ;;  %v709_v53 = vsub.s32 32, %v708_v34 }
  0x6d   : > { %vm487_vm4 = vcmp.lt.s32.totalorder %v486_v31, 0  ;;  %v488_v40 = vsub.s32 0, %v486_v31  ;;  %v608_v42 = vadd.s32 %v607_v15, %v597_v22  ;;  %vm386_vm5 = vcmp.lt.s32.totalorder %v1753_v6, 0 }
  0x6e   : > { %v630_v48 = vadd.s32 %v629_v25, %v619_v30  ;;  %v701_v55 = vand.u32 8388607, %v694_v38  ;;  %v478_v56 = vadd.s32 %v1853_v17, %v1867_v28  ;;  %v632_v58 = vmul.u32 %v1777_v33, %v578_v47 }
  0x6f   : > { %v489_v49 = vsel %vm487_vm4, %v488_v40, %v486_v31  ;;  %v1910_v51 = vadd.s32 %v608_v42, %v599_v29  ;;  %v1920_v63 = vshrl.u32 %v706_v14, 5  ;;  %v508_v61 = vsub.s32 4, %v484_v16 }
  0x70   : > { %v490_v27 = vclz %v489_v49  ;;  %v631_v54 = vadd.s32 %v630_v48, %v621_v36  ;;  %v711_v62 = vshll.u32 %v1566_v35, %v708_v34  ;;  %v714_v0 = vshll.u32 %v1567_v37, %v708_v34 }
  0x71   : > { %vm634_vm6 = vc.u32 %v1910_v51, %v1906_v44  ;;  %v715_v50 = vshrl.u32 %v1568_v39, %v709_v53  ;;  %v717_v1 = vshll.u32 %v1568_v39, %v708_v34  ;;  %v718_v17 = vshrl.u32 %v1569_v41, %v709_v53 }
  0x72   : > { %v1252_v59 = vadd.s32 4294967294, %v490_v27  ;;  %v635_v45 = vadd.s32 1, %v631_v54  ;;  %v720_v28 = vshll.u32 %v1569_v41, %v708_v34  ;;  %v721_v2 = vshrl.u32 %v1570_v43, %v709_v53 }
  0x73   : > { %v723_v11 = vshll.u32 %v1570_v43, %v708_v34  ;;  %v724_v13 = vshrl.u32 %v1571_v52, %v709_v53  ;;  %v712_v32 = vshrl.u32 %v1567_v37, %v709_v53  ;;  %v509_v19 = vsel %vm386_vm5, %v508_v61, %v484_v16 }
  0x74   : > { %vm1253_vm7 = vcmp.lt.s32.totalorder %v1252_v59, 0  ;;  %v636_v33 = vsel %vm634_vm6, %v635_v45, %v631_v54  ;;  %v702_v21 = vor.u32 8388608, %v701_v55  ;;  %v716_v24 = vor.u32 %v715_v50, %v714_v0 }
  0x75   : > { %v493_v57 = vsel %vm1253_vm7, 0, %v1252_v59  ;;  %v637_v5 = vadd.s32 %v636_v33, %v632_v58  ;;  %v719_v29 = vor.u32 %v718_v17, %v717_v1  ;;  %v722_v46 = vor.u32 %v721_v2, %v720_v28 }
  0x76   : > { %v494_v14 = vsub.s32 32, %v493_v57  ;;  %v495_v18 = vshll.u32 %v486_v31, %v493_v57  ;;  %v498_v9 = vsub.s32 4294967266, %v493_v57  ;;  %v725_v15 = vor.u32 %v724_v13, %v723_v11 }
  0x77   : > { %v638_v20 = vadd.s32 536870912, %v637_v5  ;;  %vm726_vm8 = vcmp.lt.s32.totalorder %v1920_v63, 1  ;;  %vm729_vm9 = vcmp.lt.s32.totalorder %v1920_v63, 4  ;;  %vm1940_vm10 = vcmp.le.f32.partialorder %v384_v10, 0.7853982 }
  0x78   : > { %v496_v22 = vshrl.u32 %v478_v56, %v494_v14  ;;  %v499_v26 = vadd.s32 127, %v498_v9  ;;  %v713_v34 = vor.u32 %v712_v32, %v711_v62  ;;  %v511_v36 = vsel %vm1940_vm10, 0, %v509_v19 }
  0x79   : > { %v1934_v30 = vshrl.u32 %v638_v20, 30  ;;  %vm727_vm11 = vcmp.lt.s32.totalorder %v1920_v63, 2  ;;  %vm728_vm12 = vcmp.lt.s32.totalorder %v1920_v63, 3  ;;  %v735_v10 = vsel %vm729_vm9, %v722_v46, 920167782 }
  0x7a   : > { %v497_v16 = vor.u32 %v496_v22, %v495_v18  ;;  %v500_v23 = vshll.u32 %v499_v26, 23  ;;  %v738_v47 = vsel %vm726_vm8, %v716_v24, %v719_v29  ;;  %v710_v49 = vshrl.u32 %v1566_v35, %v709_v53 }
  0x7b   : > { %v640_v25 = vshll.u32 %v1934_v30, 30  ;;  %v739_v27 = vsel %vm729_vm9, %v725_v15, 1326507024  ;;  %v1958_v54 = vshll.u32 %v702_v21, 8  ;;  %v528_v56 = vadd.s32 3, %v511_v36 }
  0x7c   : > { %v501_v40 = vor.u32 4788187, %v500_v23  ;;  %v504_v42 = vcvt.s32.f32 %v497_v16  ;;  %v734_v58 = vsel %vm726_vm8, %v713_v34, %v716_v24  ;;  %v740_v59 = vsel %vm728_vm12, %v722_v46, %v739_v27 }
  0x7d   : > { %v1953_v48 = vsub.s32 %v637_v5, %v640_v25  ;;  %v736_v53 = vsel %vm728_vm12, %v719_v29, %v735_v10  ;;  %v741_v45 = vsel %vm727_vm11, %v738_v47, %v740_v59  ;;  %v743_v0 = vand.u32 65535, %v1958_v54 }
  0x7e   : > { %v502_v55 = vand.u32 2147483647, %v501_v40  ;;  %v744_v50 = vshrl.u32 %v1958_v54, 16  ;;  %v745_v1 = vand.u32 65535, %v741_v45  ;;  %v731_v33 = vsel %vm729_vm9, %v719_v29, 2102212464 }
  0x7f   : > { %vm642_vm13 = vcmp.lt.s32.totalorder %v1953_v48, 0  ;;  %v643_v61 = vsub.s32 0, %v1953_v48  ;;  %v746_v28 = vshrl.u32 %v741_v45, 16  ;;  %vm541_vm14 = vcmp.lt.s32.totalorder %v1757_v7, 0 }
  0x80   : > { %v505_v62 = vmul.f32 %v504_v42, %v502_v55  ;;  %v633_v57 = vadd.s32 %v1906_v44, %v1910_v51  ;;  %v737_v11 = vsel %vm727_vm11, %v734_v58, %v736_v53  ;;  %v1980_v13 = vand.u32 3, %v528_v56 }
  0x81   : > { %v644_v17 = vsel %vm642_vm13, %v643_v61, %v1953_v48  ;;  %v747_v14 = vmul.u32 %v745_v1, %v743_v0  ;;  %v748_v18 = vmul.u32 %v746_v28, %v743_v0  ;;  %v1982_v9 = vmul.u32 %v745_v1, %v744_v50 }
  0x82   : > { %v506_v2 = vxor.u32 2147483648, %v505_v62  ;;  %v645_v5 = vclz %v644_v17  ;;  %v1988_v20 = vsel %vm726_vm8, %v710_v49, %v713_v34  ;;  %v1992_v44 = vsel %vm728_vm12, %v716_v24, %v731_v33 }
  0x83   : > { %v751_v21 = vshll.u32 %v748_v18, 16  ;;  %v753_v22 = vshll.u32 %v1982_v9, 16  ;;  %v768_v26 = vshrl.u32 %v737_v11, 16  ;;  %v750_v46 = vmul.u32 %v746_v28, %v744_v50 }
  0x84   : > { %v507_v32 = vsel %vm386_vm5, %v506_v2, %v505_v62  ;;  %v1255_v19 = vadd.s32 4294967294, %v645_v5  ;;  %v767_v15 = vand.u32 65535, %v737_v11  ;;  %v663_v23 = vsub.s32 4, %v1934_v30  ;;  %v2020_v5 = vld [vmem:[%s1733_s25 + $0x10] sm:$0xff] }
  0x85   : > { %v1997_v51 = vsel %vm1940_vm10, %v1753_v6, %v507_v32  ;;  %vm755_vm0 = vc.u32 %v747_v14, %v751_v21  ;;  %v757_v24 = vadd.s32 %v751_v21, %v747_v14  ;;  %v770_v10 = vmul.u32 %v768_v26, %v743_v0 }
  0x86   : > { %v512_v29 = vmul.f32 %v1997_v51, %v1997_v51  ;;  %vm1256_vm15 = vcmp.lt.s32.totalorder %v1255_v19, 0  ;;  %v756_v42 = vsel %vm755_vm0, 1, %v1572_v60  ;;  %vm2007_vm2 = vcmp.le.f32.partialorder %v539_v12, 0.7853982 }
  0x87   : > { %v648_v16 = vsel %vm1256_vm15, 0, %v1255_v19  ;;  %vm759_vm1 = vc.u32 %v757_v24, %v753_v22  ;;  %v758_v56 = vadd.s32 %v756_v42, %v750_v46  ;;  %vm534_vm3 = vcmp.eq.s32.totalorder %v1980_v13, 2 }
  0x88   : > { %v513_v34 = vmul.f32 -0.001358992, %v512_v29  ;;  %v520_v36 = vmul.f32 -0.00019511016, %v512_v29  ;;  %v649_v31 = vsub.s32 32, %v648_v16  ;;  %v650_v25 = vshll.u32 %v1953_v48, %v648_v16 }
  0x89   : > { %v653_v40 = vsub.s32 4294967266, %v648_v16  ;;  %v664_v48 = vsel %vm541_vm14, %v663_v23, %v1934_v30  ;;  %v769_v59 = vmul.u32 %v767_v15, %v743_v0  ;;  %v771_v61 = vmul.u32 %v767_v15, %v744_v50 }
  0x8a   : > { %v514_v47 = vadd.f32 0.041655596, %v513_v34  ;;  %v521_v49 = vadd.f32 0.008332121, %v520_v36  ;;  %v651_v55 = vshrl.u32 %v633_v57, %v649_v31  ;;  %v760_v12 = vsel %vm759_vm1, 1, %v1572_v60 }
  0x8b   : > { %v654_v58 = vadd.s32 127, %v653_v40  ;;  %vm531_vm4 = vcmp.eq.s32.totalorder %v1980_v13, 0  ;;  %v752_v17 = vshrl.u32 %v748_v18, 16  ;;  %v762_v33 = vadd.s32 %v760_v12, %v758_v56 }
  0x8c   : > { %v515_v53 = vmul.f32 %v514_v47, %v512_v29  ;;  %v522_v45 = vmul.f32 %v521_v49, %v512_v29  ;;  %v652_v62 = vor.u32 %v651_v55, %v650_v25  ;;  %v773_v28 = vshll.u32 %v770_v10, 16 }
  0x8d   : > { %v655_v1 = vshll.u32 %v654_v58, 23  ;;  %vm530_vm5 = vcmp.lt.s32.totalorder %v1980_v13, 2  ;;  %v754_v30 = vshrl.u32 %v1982_v9, 16  ;;  %v772_v0 = vmul.u32 %v768_v26, %v744_v50 }
  0x8e   : > { %v516_v2 = vadd.f32 -0.4999988, %v515_v53  ;;  %v523_v57 = vadd.f32 -0.16666654, %v522_v45  ;;  %v659_v14 = vcvt.s32.f32 %v652_v62  ;;  %v774_v32 = vshrl.u32 %v770_v10, 16 }
  0x8f   : > { %v656_v11 = vor.u32 4788187, %v655_v1  ;;  %v775_v19 = vshll.u32 %v771_v61, 16  ;;  %vm777_vm6 = vc.u32 %v769_v59, %v773_v28  ;;  %v779_v46 = vadd.s32 %v773_v28, %v769_v59 }
  0x90   : > { %v517_v21 = vmul.f32 %v516_v2, %v512_v29  ;;  %v524_v22 = vmul.f32 %v523_v57, %v512_v29  ;;  %v763_v15 = vadd.s32 %v762_v33, %v752_v17  ;;  %v778_v16 = vsel %vm777_vm6, 1, %v1572_v60 }
  0x91   : > { %v657_v18 = vand.u32 2147483647, %v656_v11  ;;  %v2025_v23 = vmul.f32 %v1746_v3, %v2020_v5  ;;  %v780_v26 = vadd.s32 %v778_v16, %v772_v0  ;;  %vm781_vm7 = vc.u32 %v779_v46, %v775_v19 }
  0x92   : > { %v518_v9 = vadd.f32 1.0, %v517_v21  ;;  %v525_v50 = vadd.f32 1.0, %v524_v22  ;;  %v666_v34 = vsel %vm2007_vm2, 0, %v664_v48  ;;  %v776_v36 = vshrl.u32 %v771_v61, 16 }
  0x93   : > { %v660_v24 = vmul.f32 %v659_v14, %v657_v18  ;;  %v782_v29 = vsel %vm781_vm7, 1, %v1572_v60  ;;  %v852_v42 = vand.u32 2139095040, %v2025_v23  ;;  %v733_v3 = vsel %vm727_vm11, %v1988_v20, %v1992_v44 }
  0x94   : > { %v526_v31 = vmul.f32 %v525_v50, %v1997_v51  ;;  %v535_v25 = vxor.u32 2147483648, %v518_v9  ;;  %v784_v40 = vadd.s32 %v782_v29, %v780_v26  ;;  %v2036_v47 = vadd.s32 %v763_v15, %v754_v30 }
  0x95   : > { %v661_v10 = vxor.u32 2147483648, %v660_v24  ;;  %v2038_v49 = vadd.s32 %v779_v46, %v775_v19  ;;  %v853_v51 = vshrl.u32 %v852_v42, 23  ;;  %vm527_vm8 = vweird.f32 %v1753_v6  ;;  %v2055_v6 = vld [vmem:[%s2227_s3] ss:$0 sm:$0xff] }
  0x96   : > { %v532_v55 = vxor.u32 2147483648, %v526_v31  ;;  %v536_v56 = vsel %vm534_vm3, %v535_v25, %v526_v31  ;;  %v785_v58 = vadd.s32 %v784_v40, %v774_v32  ;;  %v683_v59 = vadd.s32 3, %v666_v34 }
  0x97   : > { %v662_v48 = vsel %vm541_vm14, %v661_v10, %v660_v24  ;;  %v1260_v61 = vadd.s32 4294967169, %v853_v51  ;;  %v787_v62 = vmul.u32 %v1958_v54, %v733_v3  ;;  %vm789_vm9 = vc.u32 %v2036_v47, %v2038_v49 }
  0x98   : > { %v533_v63 = vsel %vm531_vm4, %v518_v9, %v532_v55  ;;  %v665_v20 = vsel %vm2007_vm2, %v1757_v7, %v662_v48  ;;  %v786_v44 = vadd.s32 %v785_v58, %v776_v36  ;;  %vm1024_vm10 = vcmask 261120  }
  0x99   : > { %v537_v53 = vsel %vm530_vm5, %v533_v63, %v536_v56  ;;  %v667_v45 = vmul.f32 %v665_v20, %v665_v20  ;;  %v859_v27 = vadd.s32 1, %v1260_v61  ;;  %v684_v28 = vand.u32 3, %v683_v59 }
  0x9a   : > { %v538_v12 = vsel %vm527_vm8, nan, %v537_v53  ;;  %v790_v1 = vadd.s32 1, %v786_v44  ;;  %v849_v57 = vand.u32 2147483647, %v2025_v23  ;;  %vm682_vm1 = vweird.f32 %v1757_v7 }
  0x9b   : > { %v1008_v17 = vmul.f32 %v2055_v6, %v538_v12  ;;  %v668_v33 = vmul.f32 -0.001358992, %v667_v45  ;;  %v675_v13 = vmul.f32 -0.00019511016, %v667_v45  ;;  %vm860_vm11 = vcmp.gt.s32.totalorder %v859_v27, 0 }
  0x9c   : > { %v791_v2 = vsel %vm789_vm9, %v790_v1, %v786_v44  ;;  %v861_v14 = vsel %vm860_vm11, %v859_v27, 0  ;;  %v856_v22 = vand.u32 8388607, %v849_v57  ;;  %vm685_vm12 = vcmp.lt.s32.totalorder %v684_v28, 2 }
  0x9d   : > { %v1012_v30 = vmul.f32 %v1008_v17, %v538_v12  ;;  %v669_v0 = vadd.f32 0.041655596, %v668_v33  ;;  %v676_v11 = vadd.f32 0.008332121, %v675_v13  ;;  %v792_v54 = vadd.s32 %v791_v2, %v787_v62 }
  0x9e   : > { %v863_v46 = vand.u32 31, %v861_v14  ;;  %v2067_v9 = vshrl.u32 %v861_v14, 5  ;;  %vm686_vm13 = vcmp.eq.s32.totalorder %v684_v28, 0  ;;  %vm689_vm14 = vcmp.eq.s32.totalorder %v684_v28, 2 }
  0x9f   : > { %1263 = vmatmul.msk.f32.vlgmr.msra.gmra.mxu0 %vm1024_vm10, %v1012_v30  ;;  %v670_v32 = vmul.f32 %v669_v0, %v667_v45  ;;  %v677_v19 = vmul.f32 %v676_v11, %v667_v45  ;;  %v793_v21 = vadd.s32 536870912, %v792_v54  ;;  %v857_v56 = vor.u32 8388608, %v856_v22 }
  0xa0   : > { %v2069_v50 = vsub.s32 32, %v863_v46  ;;  %v866_v26 = vshll.u32 %v1566_v35, %v863_v46  ;;  %v869_v24 = vshll.u32 %v1567_v37, %v863_v46  ;;  %v872_v40 = vshll.u32 %v1568_v39, %v863_v46 }
  0xa1   : > { %v671_v18 = vadd.f32 -0.4999988, %v670_v32  ;;  %v678_v15 = vadd.f32 -0.16666654, %v677_v19  ;;  %v2065_v16 = vshrl.u32 %v793_v21, 30  ;;  %vm881_vm15 = vcmp.lt.s32.totalorder %v2067_v9, 1 }
  0xa2   : > { %v867_v31 = vshrl.u32 %v1567_v37, %v2069_v50  ;;  %v870_v25 = vshrl.u32 %v1568_v39, %v2069_v50  ;;  %v873_v42 = vshrl.u32 %v1569_v41, %v2069_v50  ;;  %v875_v39 = vshll.u32 %v1569_v41, %v863_v46 }
  0xa3   : > { %v672_v34 = vmul.f32 %v671_v18, %v667_v45  ;;  %v679_v36 = vmul.f32 %v678_v15, %v667_v45  ;;  %v795_v29 = vshll.u32 %v2065_v16, 30  ;;  %v876_v44 = vshrl.u32 %v1570_v43, %v2069_v50 }
  0xa4   : > { %v2081_v58 = vor.u32 %v867_v31, %v866_v26  ;;  %v2083_v51 = vor.u32 %v870_v25, %v869_v24  ;;  %v2086_v63 = vor.u32 %v873_v42, %v872_v40  ;;  %v878_v61 = vshll.u32 %v1570_v43, %v863_v46 }
  0xa5   : > { %v673_v10 = vadd.f32 1.0, %v672_v34  ;;  %v680_v3 = vadd.f32 1.0, %v679_v36  ;;  %v796_v55 = vsub.s32 %v792_v54, %v795_v29  ;;  %v879_v12 = vshrl.u32 %v1571_v52, %v2069_v50 }
  0xa6   : > { %v877_v1 = vor.u32 %v876_v44, %v875_v39  ;;  %vm883_vm2 = vcmp.lt.s32.totalorder %v2067_v9, 3  ;;  %vm882_vm3 = vcmp.lt.s32.totalorder %v2067_v9, 2  ;;  %vm884_vm4 = vcmp.lt.s32.totalorder %v2067_v9, 4 }
  0xa7   : > { %v681_v37 = vmul.f32 %v680_v3, %v665_v20  ;;  %v690_v48 = vxor.u32 2147483648, %v673_v10  ;;  %vm797_vm0 = vcmp.lt.s32.totalorder %v796_v55, 0  ;;  %v798_v59 = vsub.s32 0, %v796_v55 }
  0xa8   : > { %v889_v52 = vsel %vm881_vm15, %v2081_v58, %v2083_v51  ;;  %v890_v7 = vsel %vm884_vm4, %v877_v1, 920167782  ;;  %v880_v33 = vor.u32 %v879_v12, %v878_v61  ;;  %v2109_v2 = vshll.u32 %v857_v56, 8 }
  0xa9   : > { %v687_v53 = vxor.u32 2147483648, %v681_v37  ;;  %v691_v45 = vsel %vm689_vm14, %v690_v48, %v681_v37  ;;  %v799_v62 = vsel %vm797_vm0, %v798_v59, %v796_v55  ;;  %v891_v13 = vsel %vm883_vm2, %v2086_v63, %v890_v7 }
  0xaa   : > { %v800_v20 = vclz %v799_v62  ;;  %v788_v30 = vadd.s32 %v2038_v49, %v2036_v47  ;;  %v892_v11 = vsel %vm882_vm3, %v889_v52, %v891_v13  ;;  %v893_v54 = vsel %vm881_vm15, %v2083_v51, %v2086_v63 }
  0xab   : > { %v688_v27 = vsel %vm686_vm13, %v673_v10, %v687_v53  ;;  %v894_v22 = vsel %vm884_vm4, %v880_v33, 1326507024  ;;  %v898_v46 = vand.u32 65535, %v2109_v2  ;;  %v899_v47 = vshrl.u32 %v2109_v2, 16 }
  0xac   : > { %v692_v41 = vsel %vm685_vm12, %v688_v27, %v691_v45  ;;  %v1258_v43 = vadd.s32 4294967294, %v800_v20  ;;  %v895_v26 = vsel %vm883_vm2, %v877_v1, %v894_v22  ;;  %vm696_vm6 = vcmp.lt.s32.totalorder %v1760_v8, 0 }
  0xad   : > { %v693_v17 = vsel %vm682_vm1, nan, %v692_v41  ;;  %v896_v24 = vsel %vm882_vm3, %v893_v54, %v895_v26  ;;  %v922_v34 = vand.u32 65535, %v892_v11  ;;  %v923_v36 = vshrl.u32 %v892_v11, 16 }
  0xae   : > { %v1009_v28 = vmul.f32 %v2055_v6, %v693_v17  ;;  %vm1259_vm5 = vcmp.lt.s32.totalorder %v1258_v43, 0  ;;  %v900_v25 = vand.u32 65535, %v896_v24  ;;  %v901_v40 = vshrl.u32 %v896_v24, 16 }
  0xaf   : > { %v803_v0 = vsel %vm1259_vm5, 0, %v1258_v43  ;;  %vm2133_vm7 = vcmp.le.f32.partialorder %v694_v38, 0.7853982  ;;  %v924_v42 = vmul.u32 %v922_v34, %v898_v46  ;;  %v925_v10 = vmul.u32 %v923_v36, %v898_v46 }
  0xb0   : > { %v1013_v14 = vmul.f32 %v1009_v28, %v693_v17  ;;  %v804_v32 = vsub.s32 32, %v803_v0  ;;  %v805_v19 = vshll.u32 %v796_v55, %v803_v0  ;;  %v808_v21 = vsub.s32 4294967266, %v803_v0 }
  0xb1   : > { %v926_v3 = vmul.u32 %v922_v34, %v899_v47  ;;  %v902_v37 = vmul.u32 %v900_v25, %v898_v46  ;;  %v903_v48 = vmul.u32 %v901_v40, %v898_v46  ;;  %v818_v59 = vsub.s32 4, %v2065_v16 }
  0xb2   : > { %v1017_v49 = vadd.f32 %v1013_v14, %v1749_v4  ;;  %v806_v18 = vshrl.u32 %v788_v30, %v804_v32  ;;  %v809_v15 = vadd.s32 127, %v808_v21  ;;  %v865_v39 = vshrl.u32 %v1566_v35, %v2069_v50 }
  0xb3   : > { %v904_v44 = vmul.u32 %v900_v25, %v899_v47  ;;  %v928_v61 = vshll.u32 %v925_v10, 16  ;;  %v905_v45 = vmul.u32 %v901_v40, %v899_v47  ;;  %v906_v38 = vshll.u32 %v903_v48, 16 }
  0xb4   : > { %1264 = vmatmul.msk.f32.vlgmr.msra.gmra.mxu1 %vm1024_vm10, %v1017_v49  ;;  %v807_v29 = vor.u32 %v806_v18, %v805_v19  ;;  %v810_v31 = vshll.u32 %v809_v15, 23  ;;  %v927_v62 = vmul.u32 %v923_v36, %v899_v47  ;;  %v886_v12 = vsel %vm884_vm4, %v2086_v63, 2102212464 }
  0xb5   : > { %v908_v20 = vshll.u32 %v904_v44, 16  ;;  %v930_v1 = vshll.u32 %v926_v3, 16  ;;  %vm932_vm8 = vc.u32 %v924_v42, %v928_v61  ;;  %vm910_vm9 = vc.u32 %v902_v37, %v906_v38 }
  0xb6   : > { %v811_v55 = vor.u32 4788187, %v810_v31  ;;  %v814_v56 = vcvt.s32.f32 %v807_v29  ;;  %v912_v41 = vadd.s32 %v906_v38, %v902_v37  ;;  %v933_v43 = vsel %vm932_vm8, 1, %v1572_v60 }
  0xb7   : > { %v885_v35 = vsel %vm881_vm15, %v865_v39, %v2081_v58  ;;  %v907_v50 = vshrl.u32 %v903_v48, 16  ;;  %v911_v52 = vsel %vm910_vm9, 1, %v1572_v60  ;;  %v934_v7 = vadd.s32 %v928_v61, %v924_v42 }
  0xb8   : > { %v812_v53 = vand.u32 2147483647, %v811_v55  ;;  %v913_v33 = vadd.s32 %v911_v52, %v905_v45  ;;  %vm914_vm11 = vc.u32 %v912_v41, %v908_v20  ;;  %v935_v63 = vadd.s32 %v933_v43, %v927_v62  ;;  %v1380_v52 = vld [vmem:[%s1733_s25 + $0x8] sm:$0xff] }
  0xb9   : > { %v887_v13 = vsel %vm883_vm2, %v2083_v51, %v886_v12  ;;  %v915_v28 = vsel %vm914_vm11, 1, %v1572_v60  ;;  %v929_v30 = vshrl.u32 %v925_v10, 16  ;;  %vm936_vm12 = vc.u32 %v934_v7, %v930_v1 }
  0xba   : > { %v815_v27 = vmul.f32 %v814_v56, %v812_v53  ;;  %v909_v58 = vshrl.u32 %v904_v44, 16  ;;  %v917_v11 = vadd.s32 %v915_v28, %v913_v33  ;;  %v937_v54 = vsel %vm936_vm12, 1, %v1572_v60 }
  0xbb   : > { %v819_v14 = vsel %vm696_vm6, %v818_v59, %v2065_v16  ;;  %v931_v51 = vshrl.u32 %v926_v3, 16  ;;  %v939_v19 = vadd.s32 %v937_v54, %v935_v63  ;;  %v938_v46 = vadd.s32 %v934_v7, %v930_v1 }
  0xbc   : > { %v816_v17 = vxor.u32 2147483648, %v815_v27  ;;  %v918_v22 = vadd.s32 %v917_v11, %v907_v50  ;;  %v888_v47 = vsel %vm882_vm3, %v885_v35, %v887_v13  ;;  %v821_v60 = vsel %vm2133_vm7, 0, %v819_v14 }
  0xbd   : > { %v940_v49 = vadd.s32 %v939_v19, %v929_v30  ;;  %v942_v36 = vmul.u32 %v2109_v2, %v888_v47  ;;  %v838_v29 = vadd.s32 3, %v821_v60  ;;  %vm837_vm1 = vweird.f32 %v1760_v8 }
  0xbe   : > { %v817_v0 = vsel %vm696_vm6, %v816_v17, %v815_v27  ;;  %v919_v26 = vadd.s32 %v918_v22, %v909_v58  ;;  %vm851_vm4 = vcmp.lt.s32.totalorder %v2025_v23, 0  ;;  %vm850_vm5 = vcmp.le.f32.partialorder %v849_v57, 0.7853982 }
  0xbf   : > { %v820_v32 = vsel %vm2133_vm7, %v1760_v8, %v817_v0  ;;  %v941_v16 = vadd.s32 %v940_v49, %v931_v51  ;;  %v839_v55 = vand.u32 3, %v838_v29  ;;  %vm992_vm9 = vweird.f32 %v2025_v23 }
  0xc0   : > { %v822_v21 = vmul.f32 %v820_v32, %v820_v32  ;;  %vm944_vm13 = vc.u32 %v919_v26, %v938_v46  ;;  %v943_v17 = vadd.s32 %v938_v46, %v919_v26  ;;  %vm1070_vm11 = vcmask 1040384  }
  0xc1   : > { %v945_v31 = vadd.s32 1, %v941_v16  ;;  %vm844_vm14 = vcmp.eq.s32.totalorder %v839_v55, 2  ;;  %vm841_vm15 = vcmp.eq.s32.totalorder %v839_v55, 0  ;;  %vm840_vm0 = vcmp.lt.s32.totalorder %v839_v55, 2 }
  0xc2   : > { %v823_v18 = vmul.f32 -0.001358992, %v822_v21  ;;  %v830_v15 = vmul.f32 -0.00019511016, %v822_v21 }
  0xc3   : > { %v946_v42 = vsel %vm944_vm13, %v945_v31, %v941_v16 }
  0xc4   : > { %v824_v24 = vadd.f32 0.041655596, %v823_v18  ;;  %v831_v34 = vadd.f32 0.008332121, %v830_v15  ;;  %v947_v3 = vadd.s32 %v946_v42, %v942_v36 }
  0xc6   : > { %v825_v25 = vmul.f32 %v824_v24, %v822_v21  ;;  %v832_v40 = vmul.f32 %v831_v34, %v822_v21  ;;  %v948_v37 = vadd.s32 536870912, %v947_v3 }
  0xc8   : > { %v826_v9 = vadd.f32 -0.4999988, %v825_v25  ;;  %v833_v10 = vadd.f32 -0.16666654, %v832_v40  ;;  %v949_v39 = vshrl.u32 %v948_v37, 30 }
  0xca   : > { %v827_v4 = vmul.f32 %v826_v9, %v822_v21  ;;  %v834_v56 = vmul.f32 %v833_v10, %v822_v21  ;;  %v950_v2 = vshll.u32 %v949_v39, 30  ;;  %v973_v51 = vsub.s32 4, %v949_v39 }
  0xcc   : > { %v828_v48 = vadd.f32 1.0, %v827_v4  ;;  %v835_v59 = vadd.f32 1.0, %v834_v56  ;;  %v951_v38 = vsub.s32 %v947_v3, %v950_v2  ;;  %v974_v22 = vsel %vm851_vm4, %v973_v51, %v949_v39 }
  0xcd   : > { %v976_v49 = vsel %vm850_vm5, 0, %v974_v22 }
  0xce   : > { %v836_v44 = vmul.f32 %v835_v59, %v820_v32  ;;  %v845_v61 = vxor.u32 2147483648, %v828_v48  ;;  %vm952_vm2 = vcmp.lt.s32.totalorder %v951_v38, 0  ;;  %v953_v12 = vsub.s32 0, %v951_v38 }
  0xcf   : > { %v993_v16 = vadd.s32 3, %v976_v49 }
  0xd0   : > { %v842_v53 = vxor.u32 2147483648, %v836_v44  ;;  %v846_v45 = vsel %vm844_vm14, %v845_v61, %v836_v44  ;;  %v954_v27 = vsel %vm952_vm2, %v953_v12, %v951_v38 }
  0xd1   : > { %v955_v43 = vclz %v954_v27  ;;  %v994_v31 = vand.u32 3, %v993_v16 }
  0xd2   : > { %v843_v62 = vsel %vm841_vm15, %v828_v48, %v842_v53 }
  0xd3   : > { %v847_v20 = vsel %vm840_vm0, %v843_v62, %v846_v45  ;;  %v1261_v50 = vadd.s32 4294967294, %v955_v43  ;;  %vm999_vm6 = vcmp.eq.s32.totalorder %v994_v31, 2  ;;  %vm996_vm7 = vcmp.eq.s32.totalorder %v994_v31, 0 }
  0xd4   : > { %v848_v1 = vsel %vm837_vm1, nan, %v847_v20  ;;  %vm995_vm8 = vcmp.lt.s32.totalorder %v994_v31, 2 }
  0xd5   : > { %v1010_v41 = vmul.f32 %v2055_v6, %v848_v1  ;;  %vm1262_vm3 = vcmp.lt.s32.totalorder %v1261_v50, 0 }
  0xd6   : > { %v958_v33 = vsel %vm1262_vm3, 0, %v1261_v50 }
  0xd7   : > { %v1014_v35 = vmul.f32 %v1010_v41, %v848_v1  ;;  %v959_v63 = vsub.s32 32, %v958_v33  ;;  %v960_v8 = vshll.u32 %v951_v38, %v958_v33  ;;  %v963_v13 = vsub.s32 4294967266, %v958_v33 }
  0xd9   : > { %v1018_v7 = vadd.f32 %v1380_v52, %v1014_v35  ;;  %v961_v28 = vshrl.u32 %v943_v17, %v959_v63  ;;  %v964_v30 = vadd.s32 127, %v963_v13 }
  0xdb   : > { %1265 = vmatmul.msk.f32.vlgmr.msra.gmra.mxu2 %vm1024_vm10, %v1018_v7  ;;  %v962_v0 = vor.u32 %v961_v28, %v960_v8  ;;  %v965_v58 = vshll.u32 %v964_v30, 23 }
  0xdd   : > { %v966_v11 = vor.u32 4788187, %v965_v58  ;;  %v969_v54 = vcvt.s32.f32 %v962_v0 }
  0xdf   : > { %v967_v14 = vand.u32 2147483647, %v966_v11 }
  0xe1   : > { %v970_v32 = vmul.f32 %v969_v54, %v967_v14 }
  0xe3   : > { %v971_v19 = vxor.u32 2147483648, %v970_v32 }
  0xe5   : > { %v972_v21 = vsel %vm851_vm4, %v971_v19, %v970_v32 }
  0xe6   : > { %v975_v46 = vsel %vm850_vm5, %v2025_v23, %v972_v21 }
  0xe7   : > { %v977_v47 = vmul.f32 %v975_v46, %v975_v46 }
  0xe9   : > { %v978_v60 = vmul.f32 -0.001358992, %v977_v47  ;;  %v985_v18 = vmul.f32 -0.00019511016, %v977_v47 }
  0xeb   : > { %v979_v15 = vadd.f32 0.041655596, %v978_v60  ;;  %v986_v26 = vadd.f32 0.008332121, %v985_v18 }
  0xed   : > { %v980_v24 = vmul.f32 %v979_v15, %v977_v47  ;;  %v987_v34 = vmul.f32 %v986_v26, %v977_v47 }
  0xef   : > { %v981_v36 = vadd.f32 -0.4999988, %v980_v24  ;;  %v988_v29 = vadd.f32 -0.16666654, %v987_v34 }
  0xf1   : > { %v982_v25 = vmul.f32 %v981_v36, %v977_v47  ;;  %v989_v40 = vmul.f32 %v988_v29, %v977_v47 }
  0xf3   : > { %v983_v57 = vadd.f32 1.0, %v982_v25  ;;  %v990_v42 = vadd.f32 1.0, %v989_v40 }
  0xf5   : > { %v991_v9 = vmul.f32 %v990_v42, %v975_v46  ;;  %v1000_v10 = vxor.u32 2147483648, %v983_v57 }
  0xf7   : > { %v997_v3 = vxor.u32 2147483648, %v991_v9  ;;  %v1001_v55 = vsel %vm999_vm6, %v1000_v10, %v991_v9 }
  0xf9   : > { %v998_v4 = vsel %vm996_vm7, %v983_v57, %v997_v3 }
  0xfa   : > { %v1002_v56 = vsel %vm995_vm8, %v998_v4, %v1001_v55 }
  0xfb   : > { %v1003_v37 = vsel %vm992_vm9, nan, %v1002_v56 }
  0xfc   : > { %v1011_v48 = vmul.f32 %v2055_v6, %v1003_v37 }
  0xfe   : > { %v1015_v59 = vmul.f32 %v1011_v48, %v1003_v37 }
 0x100   : > { %v1019_v39 = vadd.f32 %v1015_v59, %v2020_v5  ;;  %v1379_v5 = vld [vmem:[%s2229_s5] ss:$0 sm:$0xff] }
 0x102   : > { %1266 = vmatmul.msk.f32.vlgmr.msra.gmra.mxu3 %vm1024_vm10, %v1019_v39  ;;  %vm1097_vm10 = vcmask 523264  }
 0x11c   : > { %v1054_v44 = vpop.f32.mrf.mxu0 }
 0x11d   : > { %v1071_v61 = vrot.slane %v1054_v44, 7 }
 0x131   : > { %v1057_v2 = vpop.f32.mrf.mxu1 }
 0x132   : > { %v1072_v53 = vrot.slane %v1057_v2, 7 }
 0x134   : > { %v1073_v45 = vsel %vm1070_vm11, %v1071_v61, %v1072_v53 }
 0x135   : > { %1078 = vrot.lane.b32.xlu0 %v1073_v45, %s1573_s20 }
 0x15e   : > { %v1060_v23 = vpop.f32.mrf.mxu2 }
 0x15f   : > { %v1074_v38 = vrot.slane %v1060_v23, 7 }
 0x161   : > { %v1075_v62 = vsel %vm1070_vm11, %v1072_v53, %v1074_v38 }
 0x162   : > { %1080 = vrot.lane.b32.xlu0 %v1075_v62, %s1573_s20 }
 0x185   : > { %v1063_v6 = vpop.f32.mrf.mxu3 }
 0x186   : > { %v1076_v12 = vrot.slane %v1063_v6, 7 }
 0x188   : > { %v1077_v20 = vsel %vm1070_vm11, %v1074_v38, %v1076_v12 }
 0x189   : > { %1082 = vrot.lane.b32.xlu1 %v1077_v20, %s1573_s20 }
 0x1a7   : > { %v1079_v1 = vpop.permute.xlu0 %1078 }
 0x1a8   : > { %v1087_v27 = vadd.f32 %v1079_v1, %v1057_v2 }
 0x1aa   : > { %v1094_v41 = vadd.f32 %v1379_v5, %v1087_v27 }
 0x1ac   : > { %1098 = vst.msk [vmem:[%s360_s9] sm:$0xff] %vm1097_vm10, %v1094_v41 }
 0x1d4   : > { %v1081_v43 = vpop.permute.xlu0 %1080 }
 0x1d5   : > { %v1088_v35 = vadd.f32 %v1081_v43, %v1060_v23 }
 0x1d7   : > { %v1095_v50 = vadd.f32 %v1379_v5, %v1088_v35 }
 0x1d9   : > { %1099 = vst.msk [vmem:[%s360_s9 + $0x8] sm:$0xff] %vm1097_vm10, %v1095_v50 }
 0x1fb   : > { %v1083_v52 = vpop.permute.xlu1 %1082 }
 0x1fc   : > { %v1089_v7 = vadd.f32 %v1083_v52, %v1063_v6 }
 0x1fe   : > { %v1096_v17 = vadd.f32 %v1379_v5, %v1089_v7 }
 0x200   : > { %1100 = vst.msk [vmem:[%s360_s9 + $0x10] sm:$0xff] %vm1097_vm10, %v1096_v17 }
 0x201   : > { %1498 = shalt.err (!%p1495_p13)
}
 0x202   : > { %s1574_s11 = smov 128   ;;  %s1575_s19 = smov 8  }
 0x203   : > { %1295 = dma.vmem_to_hbm [thread:$0]  (%p1685_p4), %s1117_s15, 384, %s1119_s10, %s1102_s17, %s1574_s11, %s1574_s11, %s1575_s19  }
 0x204 PF: > { %s1133_s16 = sand.u32 1, %s1541_s21   ;;  %p1309_p0 = pnand %p1244_p6, %p1693_p7 }
 0x205   : > { %s1134_s20 = scalar_lea.sflag [#allocation4], %s1133_s16 }
 0x206   : > { %p1310_p2 = pneg %p1309_p0 }
 0x208   : > { %1536 = dma.done.wait (%p1310_p2), %s1134_s20, 384  }
 0x209   : > { %1538 = vsyncadd (%p1310_p2), %s1134_s20, 4294966912  ;;  %s25_s26 = sadd.s32 1, %s1561_s26   ;;  %s2261_s28 = sld [smem:[#allocation13_spill]] }
 0x20a   : > { %p22_p5 = scmp.ge.s32.totalorder %s25_s26, 4   ;;  %s2262_s23 = sld [smem:[#allocation16_spill]] }
 0x20b   : > { %s2263_s24 = sld [smem:[#allocation14_spill]]  ;;  %s2265_s21 = smov %s1545_s22 }
 0x20c   : > { %s2264_s25 = sld [smem:[#allocation15_spill]]  ;;  %24 = sbr.rel (!%p22_p5) target bundleno = 11 (0xb), region = 106 }
 0x20f   : > { %s2266_s22 = smov %s2261_s28 }
 0x211   :  { %1140 = vsyncpa [#allocation3], 1 }
 0x212   :  { %1142 = vsyncpa [#allocation3 + $0x1], 1 }
 0x213   :  { %1143 = vsyncpa [#allocation6], 1 }
 0x214   :  { %1145 = vsyncpa [#allocation6 + $0x1], 1 }
 0x215   :  { %1146 = vsyncpa [#allocation4], 1 }
 0x216   :  { %1148 = vsyncpa [#allocation4 + $0x1], 1 }

</bundles_post_ra>
